<compile_context>
chip_gen: v7x
topology: tpu7x:2x2x1
jax: 0.10.0
libtpu: 0.0.40
codegen_flags: <defaults>
</compile_context>

<pallas_src>
import jax
import jax.numpy as jnp
from jax.experimental import pallas as pl
from jax.experimental.pallas import tpu as pltpu

# Module defaults (scaled-down batch)
INPUT_SIZE = 8
HIDDEN_SIZE = 8
NUM_LAYERS = 8
OUTPUT_SIZE = 1
SEQ_LENGTH = 5
BATCH = 2


def lstm_fc_kernel(x_ref, h0_ref, c0_ref, wih_ref, whh_ref, b_ref,
                   fcw_ref, fcb_ref, out_ref, seq_ref):
    """Stacked LSTM over the full sequence + Linear head on the last step.

    x_ref   : (T*B, I)   time-major, flattened input sequence (I == H)
    h0_ref  : (L, B, H)  initial hidden states
    c0_ref  : (L, B, H)  initial cell states
    wih_ref : (L, I, 4H) input->gates weights (pre-transposed)
    whh_ref : (L, H, 4H) hidden->gates weights (pre-transposed)
    b_ref   : (L, 1, 4H) combined bias (b_ih + b_hh)
    fcw_ref : (1, H)     fc weight (O == 1)
    fcb_ref : (1, 1)     fc bias
    out_ref : (B, 1)     prediction at the last time step
    seq_ref : (T*B, H)   VMEM scratch holding the per-layer sequence output
    """
    TB, I = x_ref.shape
    L, B, H = h0_ref.shape
    T = TB // B

    # Stage the sequence with one contiguous copy (wrapper already made it
    # time-major + flattened).
    seq_ref[...] = x_ref[...]

    def layer_body(l, _h_carry):
        w_ih = wih_ref[l]          # (I, 4H)
        w_hh = whh_ref[l]          # (H, 4H)
        b = b_ref[l]               # (1, 4H)
        h = h0_ref[l]              # (B, H)
        c = c0_ref[l]              # (B, H)

        # Hoisted input projection for ALL timesteps of this layer:
        # one (T*B, I) @ (I, 4H) MXU matmul instead of T tiny ones.
        pre = jnp.dot(seq_ref[...], w_ih,
                      preferred_element_type=jnp.float32) + b      # (T*B, 4H)

        for t in range(T):  # short fixed trip count: unrolled for the scheduler
            # Recurrent h @ W_hh on the VPU: K = H = 8 is far too small to be
            # worth an MXU push/pop round trip on the serial critical path.
            terms = [h[:, k:k + 1] * w_hh[k:k + 1, :] for k in range(H)]
            while len(terms) > 1:  # tree-sum to shorten the add chain
                nxt = [terms[i] + terms[i + 1]
                       for i in range(0, len(terms) - 1, 2)]
                if len(terms) % 2:
                    nxt.append(terms[-1])
                terms = nxt
            gates = pre[t * B:(t + 1) * B, :] + terms[0]            # (B, 4H)

            # Transcendentals once on the full 4H-lane vector, then slice.
            sg = jax.nn.sigmoid(gates)
            tg = jnp.tanh(gates)
            i_g = sg[:, 0:H]
            f_g = sg[:, H:2 * H]
            g_g = tg[:, 2 * H:3 * H]
            o_g = sg[:, 3 * H:4 * H]

            c = f_g * c + i_g * g_g
            h = o_g * jnp.tanh(c)
            # Write once for the next layer's bulk read; h/c stay in vregs.
            seq_ref[t * B:(t + 1) * B, :] = h

        # TODO(synk): PyTorch applies dropout(p=0.2) between LSTM layers only in
        # training mode; inference semantics (no dropout) are implemented here.
        return h

    h_last = jax.lax.fori_loop(0, L, layer_body,
                               jnp.zeros((B, H), jnp.float32))

    # Linear head on the last time step only. O == 1, so a VPU/XLU lane
    # reduction replaces a degenerate (B,H)@(H,1) MXU matmul.
    out_ref[...] = (jnp.sum(h_last * fcw_ref[...], axis=-1, keepdims=True)
                    + fcb_ref[...])


def net_forward(x, h0, c0, w_ih_t, w_hh_t, b, fc_w, fc_b):
    B, T, I = x.shape
    L, _, H = h0.shape
    O = fc_w.shape[0]
    # Stacked-weight layout (and seq scratch reuse) requires input_size == hidden_size.
    assert I == H, "this kernel assumes input_size == hidden_size"
    assert O == 1, "FC head is implemented as a lane reduction (output_size == 1)"

    # Wrapper-side layout plumbing (free to XLA): time-major + flattened so the
    # kernel stages x with one copy and the per-layer input projection is a
    # single (T*B, I) @ (I, 4H) matmul.
    x_tm = jnp.transpose(x, (1, 0, 2)).reshape(T * B, I)

    vspec = lambda: pl.BlockSpec(memory_space=pltpu.MemorySpace.VMEM)
    return pl.pallas_call(
        lstm_fc_kernel,
        out_shape=jax.ShapeDtypeStruct((B, O), jnp.float32),
        in_specs=[vspec() for _ in range(8)],
        out_specs=vspec(),
        scratch_shapes=[pltpu.VMEM((T * B, H), jnp.float32)],
    )(x_tm, h0, c0, w_ih_t, w_hh_t, b, fc_w, fc_b)


def init_params(key):
    """Deterministic parameter init (PyTorch-style U(-1/sqrt(H), 1/sqrt(H)))."""
    H, I, L, O = HIDDEN_SIZE, INPUT_SIZE, NUM_LAYERS, OUTPUT_SIZE
    bound = 1.0 / jnp.sqrt(jnp.float32(H))
    ks = jax.random.split(key, 6)
    # nn.LSTM: weight_ih_l{k} (4H, I or H), weight_hh_l{k} (4H, H), two biases (4H,)
    # Layer-0 input dim equals H here (I == H), so one stacked tensor works.
    w_ih = jax.random.uniform(ks[0], (L, 4 * H, I), jnp.float32, -bound, bound)
    w_hh = jax.random.uniform(ks[1], (L, 4 * H, H), jnp.float32, -bound, bound)
    b_ih = jax.random.uniform(ks[2], (L, 4 * H), jnp.float32, -bound, bound)
    b_hh = jax.random.uniform(ks[3], (L, 4 * H), jnp.float32, -bound, bound)
    fc_w = jax.random.uniform(ks[4], (O, H), jnp.float32, -bound, bound)
    fc_b = jax.random.uniform(ks[5], (O,), jnp.float32, -bound, bound)
    # Glue: pre-transpose for x @ W in the kernel, fold the two biases.
    w_ih_t = jnp.transpose(w_ih, (0, 2, 1))               # (L, I, 4H)
    w_hh_t = jnp.transpose(w_hh, (0, 2, 1))               # (L, H, 4H)
    b = (b_ih + b_hh)[:, None, :]                         # (L, 1, 4H)
    fc_b2 = fc_b[None, :]                                 # (1, O)
    return w_ih_t, w_hh_t, b, fc_w, fc_b2


if __name__ == "__main__":
    key = jax.random.PRNGKey(0)
    k_x, k_h, k_c, k_p = jax.random.split(key, 4)

    # Input: (batch, seq_len, input_size) — batch_first like the PyTorch module.
    x = jax.random.normal(k_x, (BATCH, SEQ_LENGTH, INPUT_SIZE), jnp.float32)
    # The module draws fresh random h_0 / c_0 every forward (torch.randn);
    # generate them deterministically here.
    h0 = jax.random.normal(k_h, (NUM_LAYERS, BATCH, HIDDEN_SIZE), jnp.float32)
    c0 = jax.random.normal(k_c, (NUM_LAYERS, BATCH, HIDDEN_SIZE), jnp.float32)

    params = init_params(k_p)

    pred = net_forward(x, h0, c0, *params)
    pred = jax.block_until_ready(pred)
    assert pred.shape == (BATCH, OUTPUT_SIZE), pred.shape
    assert bool(jnp.all(jnp.isfinite(pred)))
    print("KERNEL_OK")
</pallas_src>

<mosaic_0001>
module attributes {stable_mosaic.version = 11 : i64} {
  func.func @lstm_fc_kernel(%arg0: memref<10x8xf32, #tpu.memory_space<vmem>>, %arg1: memref<8x2x8xf32, #tpu.memory_space<vmem>>, %arg2: memref<8x2x8xf32, #tpu.memory_space<vmem>>, %arg3: memref<8x8x32xf32, #tpu.memory_space<vmem>>, %arg4: memref<8x8x32xf32, #tpu.memory_space<vmem>>, %arg5: memref<8x1x32xf32, #tpu.memory_space<vmem>>, %arg6: memref<1x8xf32, #tpu.memory_space<vmem>>, %arg7: memref<1x1xf32, #tpu.memory_space<vmem>>, %arg8: memref<2x1xf32, #tpu.memory_space<vmem>>, %arg9: memref<10x8xf32, #tpu.memory_space<vmem>>) attributes {dimension_semantics = [], scalar_prefetch = 0 : i64, scratch_operands = 1 : i64, tpu.core_type = #tpu.core_type<tc>} {
    %c0 = arith.constant 0 : index
    %c0_0 = arith.constant 0 : index
    %0 = vector.load %arg0[%c0, %c0_0] : memref<10x8xf32, #tpu.memory_space<vmem>>, vector<10x8xf32>
    %c0_1 = arith.constant 0 : index
    %c0_2 = arith.constant 0 : index
    %1 = vector.load %arg9[%c0_1, %c0_2] : memref<10x8xf32, #tpu.memory_space<vmem>>, vector<10x8xf32>
    tpu.vector_store %arg9[%c0_1, %c0_2], %0 {strides = array<i32>} : memref<10x8xf32, #tpu.memory_space<vmem>>, vector<10x8xf32>,
    %cst = arith.constant 0.000000e+00 : f32
    %2 = vector.broadcast %cst : f32 to vector<2x8xf32>
    %c0_i32 = arith.constant 0 : i32
    %c8_i32 = arith.constant 8 : i32
    %3 = arith.addi %c0_i32, %c8_i32 : i32
    %c1_i32 = arith.constant 1 : i32
    %4 = scf.for %arg10 = %c0_i32 to %3 step %c1_i32 iter_args(%arg11 = %2) -> (vector<2x8xf32>)  : i32 {
      %14 = arith.index_cast %arg10 : i32 to index
      %c0_11 = arith.constant 0 : index
      %c0_12 = arith.constant 0 : index
      %15 = vector.load %arg3[%14, %c0_11, %c0_12] : memref<8x8x32xf32, #tpu.memory_space<vmem>>, vector<1x8x32xf32>
      %16 = vector.shape_cast %15 : vector<1x8x32xf32> to vector<8x32xf32>
      %17 = arith.index_cast %arg10 : i32 to index
      %c0_13 = arith.constant 0 : index
      %c0_14 = arith.constant 0 : index
      %18 = vector.load %arg4[%17, %c0_13, %c0_14] : memref<8x8x32xf32, #tpu.memory_space<vmem>>, vector<1x8x32xf32>
      %19 = vector.shape_cast %18 : vector<1x8x32xf32> to vector<8x32xf32>
      %20 = arith.index_cast %arg10 : i32 to index
      %c0_15 = arith.constant 0 : index
      %c0_16 = arith.constant 0 : index
      %21 = vector.load %arg5[%20, %c0_15, %c0_16] : memref<8x1x32xf32, #tpu.memory_space<vmem>>, vector<1x1x32xf32>
      %22 = vector.shape_cast %21 : vector<1x1x32xf32> to vector<1x32xf32>
      %23 = arith.index_cast %arg10 : i32 to index
      %c0_17 = arith.constant 0 : index
      %c0_18 = arith.constant 0 : index
      %24 = vector.load %arg1[%23, %c0_17, %c0_18] : memref<8x2x8xf32, #tpu.memory_space<vmem>>, vector<1x2x8xf32>
      %25 = vector.shape_cast %24 : vector<1x2x8xf32> to vector<2x8xf32>
      %26 = arith.index_cast %arg10 : i32 to index
      %c0_19 = arith.constant 0 : index
      %c0_20 = arith.constant 0 : index
      %27 = vector.load %arg2[%26, %c0_19, %c0_20] : memref<8x2x8xf32, #tpu.memory_space<vmem>>, vector<1x2x8xf32>
      %28 = vector.shape_cast %27 : vector<1x2x8xf32> to vector<2x8xf32>
      %c0_21 = arith.constant 0 : index
      %c0_22 = arith.constant 0 : index
      %29 = vector.load %arg9[%c0_21, %c0_22] : memref<10x8xf32, #tpu.memory_space<vmem>>, vector<10x8xf32>
      %cst_23 = arith.constant dense<0.000000e+00> : vector<10x32xf32>
      %30 = tpu.matmul %29, %16, %cst_23 {dimension_numbers = #tpu.dot_dimension_numbers<[1], [0], [0], [1], [0, 0, 1, 1], [], []>} : vector<10x8xf32>, vector<8x32xf32>, vector<10x32xf32> -> vector<10x32xf32>
      %31 = vector.broadcast %22 : vector<1x32xf32> to vector<10x32xf32>
      %32 = arith.addf %30, %31 : vector<10x32xf32>
      %33 = vector.extract_strided_slice %25 {offsets = [0, 0], sizes = [2, 1], strides = [1, 1]} : vector<2x8xf32> to vector<2x1xf32>
      %34 = vector.extract_strided_slice %19 {offsets = [0, 0], sizes = [1, 32], strides = [1, 1]} : vector<8x32xf32> to vector<1x32xf32>
      %35 = vector.broadcast %33 : vector<2x1xf32> to vector<2x32xf32>
      %36 = vector.broadcast %34 : vector<1x32xf32> to vector<2x32xf32>
      %37 = arith.mulf %35, %36 : vector<2x32xf32>
      %38 = vector.extract_strided_slice %25 {offsets = [0, 1], sizes = [2, 1], strides = [1, 1]} : vector<2x8xf32> to vector<2x1xf32>
      %39 = vector.extract_strided_slice %19 {offsets = [1, 0], sizes = [1, 32], strides = [1, 1]} : vector<8x32xf32> to vector<1x32xf32>
      %40 = vector.broadcast %38 : vector<2x1xf32> to vector<2x32xf32>
      %41 = vector.broadcast %39 : vector<1x32xf32> to vector<2x32xf32>
      %42 = arith.mulf %40, %41 : vector<2x32xf32>
      %43 = vector.extract_strided_slice %25 {offsets = [0, 2], sizes = [2, 1], strides = [1, 1]} : vector<2x8xf32> to vector<2x1xf32>
      %44 = vector.extract_strided_slice %19 {offsets = [2, 0], sizes = [1, 32], strides = [1, 1]} : vector<8x32xf32> to vector<1x32xf32>
      %45 = vector.broadcast %43 : vector<2x1xf32> to vector<2x32xf32>
      %46 = vector.broadcast %44 : vector<1x32xf32> to vector<2x32xf32>
      %47 = arith.mulf %45, %46 : vector<2x32xf32>
      %48 = vector.extract_strided_slice %25 {offsets = [0, 3], sizes = [2, 1], strides = [1, 1]} : vector<2x8xf32> to vector<2x1xf32>
      %49 = vector.extract_strided_slice %19 {offsets = [3, 0], sizes = [1, 32], strides = [1, 1]} : vector<8x32xf32> to vector<1x32xf32>
      %50 = vector.broadcast %48 : vector<2x1xf32> to vector<2x32xf32>
      %51 = vector.broadcast %49 : vector<1x32xf32> to vector<2x32xf32>
      %52 = arith.mulf %50, %51 : vector<2x32xf32>
      %53 = vector.extract_strided_slice %25 {offsets = [0, 4], sizes = [2, 1], strides = [1, 1]} : vector<2x8xf32> to vector<2x1xf32>
      %54 = vector.extract_strided_slice %19 {offsets = [4, 0], sizes = [1, 32], strides = [1, 1]} : vector<8x32xf32> to vector<1x32xf32>
      %55 = vector.broadcast %53 : vector<2x1xf32> to vector<2x32xf32>
      %56 = vector.broadcast %54 : vector<1x32xf32> to vector<2x32xf32>
      %57 = arith.mulf %55, %56 : vector<2x32xf32>
      %58 = vector.extract_strided_slice %25 {offsets = [0, 5], sizes = [2, 1], strides = [1, 1]} : vector<2x8xf32> to vector<2x1xf32>
      %59 = vector.extract_strided_slice %19 {offsets = [5, 0], sizes = [1, 32], strides = [1, 1]} : vector<8x32xf32> to vector<1x32xf32>
      %60 = vector.broadcast %58 : vector<2x1xf32> to vector<2x32xf32>
      %61 = vector.broadcast %59 : vector<1x32xf32> to vector<2x32xf32>
      %62 = arith.mulf %60, %61 : vector<2x32xf32>
      %63 = vector.extract_strided_slice %25 {offsets = [0, 6], sizes = [2, 1], strides = [1, 1]} : vector<2x8xf32> to vector<2x1xf32>
      %64 = vector.extract_strided_slice %19 {offsets = [6, 0], sizes = [1, 32], strides = [1, 1]} : vector<8x32xf32> to vector<1x32xf32>
      %65 = vector.broadcast %63 : vector<2x1xf32> to vector<2x32xf32>
      %66 = vector.broadcast %64 : vector<1x32xf32> to vector<2x32xf32>
      %67 = arith.mulf %65, %66 : vector<2x32xf32>
      %68 = vector.extract_strided_slice %25 {offsets = [0, 7], sizes = [2, 1], strides = [1, 1]} : vector<2x8xf32> to vector<2x1xf32>
      %69 = vector.extract_strided_slice %19 {offsets = [7, 0], sizes = [1, 32], strides = [1, 1]} : vector<8x32xf32> to vector<1x32xf32>
      %70 = vector.broadcast %68 : vector<2x1xf32> to vector<2x32xf32>
      %71 = vector.broadcast %69 : vector<1x32xf32> to vector<2x32xf32>
      %72 = arith.mulf %70, %71 : vector<2x32xf32>
      %73 = arith.addf %37, %42 : vector<2x32xf32>
      %74 = arith.addf %47, %52 : vector<2x32xf32>
      %75 = arith.addf %57, %62 : vector<2x32xf32>
      %76 = arith.addf %67, %72 : vector<2x32xf32>
      %77 = arith.addf %73, %74 : vector<2x32xf32>
      %78 = arith.addf %75, %76 : vector<2x32xf32>
      %79 = arith.addf %77, %78 : vector<2x32xf32>
      %80 = vector.extract_strided_slice %32 {offsets = [0, 0], sizes = [2, 32], strides = [1, 1]} : vector<10x32xf32> to vector<2x32xf32>
      %81 = arith.addf %80, %79 : vector<2x32xf32>
      %82 = arith.negf %81 : vector<2x32xf32>
      %83 = math.exp %82 : vector<2x32xf32>
      %cst_24 = arith.constant 1.000000e+00 : f32
      %84 = vector.broadcast %cst_24 : f32 to vector<2x32xf32>
      %85 = arith.addf %84, %83 : vector<2x32xf32>
      %86 = arith.divf %84, %85 : vector<2x32xf32>
      %87 = math.tanh %81 : vector<2x32xf32>
      %88 = vector.extract_strided_slice %86 {offsets = [0, 0], sizes = [2, 8], strides = [1, 1]} : vector<2x32xf32> to vector<2x8xf32>
      %89 = vector.extract_strided_slice %86 {offsets = [0, 8], sizes = [2, 8], strides = [1, 1]} : vector<2x32xf32> to vector<2x8xf32>
      %90 = vector.extract_strided_slice %87 {offsets = [0, 16], sizes = [2, 8], strides = [1, 1]} : vector<2x32xf32> to vector<2x8xf32>
      %91 = vector.extract_strided_slice %86 {offsets = [0, 24], sizes = [2, 8], strides = [1, 1]} : vector<2x32xf32> to vector<2x8xf32>
      %92 = arith.mulf %89, %28 : vector<2x8xf32>
      %93 = arith.mulf %88, %90 : vector<2x8xf32>
      %94 = arith.addf %92, %93 : vector<2x8xf32>
      %95 = math.tanh %94 : vector<2x8xf32>
      %96 = arith.mulf %91, %95 : vector<2x8xf32>
      %c0_25 = arith.constant 0 : index
      %c0_26 = arith.constant 0 : index
      %97 = vector.load %arg9[%c0_25, %c0_26] : memref<10x8xf32, #tpu.memory_space<vmem>>, vector<2x8xf32>
      tpu.vector_store %arg9[%c0_25, %c0_26], %96 {strides = array<i32>} : memref<10x8xf32, #tpu.memory_space<vmem>>, vector<2x8xf32>,
      %98 = vector.extract_strided_slice %96 {offsets = [0, 0], sizes = [2, 1], strides = [1, 1]} : vector<2x8xf32> to vector<2x1xf32>
      %99 = vector.extract_strided_slice %19 {offsets = [0, 0], sizes = [1, 32], strides = [1, 1]} : vector<8x32xf32> to vector<1x32xf32>
      %100 = vector.broadcast %98 : vector<2x1xf32> to vector<2x32xf32>
      %101 = vector.broadcast %99 : vector<1x32xf32> to vector<2x32xf32>
      %102 = arith.mulf %100, %101 : vector<2x32xf32>
      %103 = vector.extract_strided_slice %96 {offsets = [0, 1], sizes = [2, 1], strides = [1, 1]} : vector<2x8xf32> to vector<2x1xf32>
      %104 = vector.extract_strided_slice %19 {offsets = [1, 0], sizes = [1, 32], strides = [1, 1]} : vector<8x32xf32> to vector<1x32xf32>
      %105 = vector.broadcast %103 : vector<2x1xf32> to vector<2x32xf32>
      %106 = vector.broadcast %104 : vector<1x32xf32> to vector<2x32xf32>
      %107 = arith.mulf %105, %106 : vector<2x32xf32>
      %108 = vector.extract_strided_slice %96 {offsets = [0, 2], sizes = [2, 1], strides = [1, 1]} : vector<2x8xf32> to vector<2x1xf32>
      %109 = vector.extract_strided_slice %19 {offsets = [2, 0], sizes = [1, 32], strides = [1, 1]} : vector<8x32xf32> to vector<1x32xf32>
      %110 = vector.broadcast %108 : vector<2x1xf32> to vector<2x32xf32>
      %111 = vector.broadcast %109 : vector<1x32xf32> to vector<2x32xf32>
      %112 = arith.mulf %110, %111 : vector<2x32xf32>
      %113 = vector.extract_strided_slice %96 {offsets = [0, 3], sizes = [2, 1], strides = [1, 1]} : vector<2x8xf32> to vector<2x1xf32>
      %114 = vector.extract_strided_slice %19 {offsets = [3, 0], sizes = [1, 32], strides = [1, 1]} : vector<8x32xf32> to vector<1x32xf32>
      %115 = vector.broadcast %113 : vector<2x1xf32> to vector<2x32xf32>
      %116 = vector.broadcast %114 : vector<1x32xf32> to vector<2x32xf32>
      %117 = arith.mulf %115, %116 : vector<2x32xf32>
      %118 = vector.extract_strided_slice %96 {offsets = [0, 4], sizes = [2, 1], strides = [1, 1]} : vector<2x8xf32> to vector<2x1xf32>
      %119 = vector.extract_strided_slice %19 {offsets = [4, 0], sizes = [1, 32], strides = [1, 1]} : vector<8x32xf32> to vector<1x32xf32>
      %120 = vector.broadcast %118 : vector<2x1xf32> to vector<2x32xf32>
      %121 = vector.broadcast %119 : vector<1x32xf32> to vector<2x32xf32>
      %122 = arith.mulf %120, %121 : vector<2x32xf32>
      %123 = vector.extract_strided_slice %96 {offsets = [0, 5], sizes = [2, 1], strides = [1, 1]} : vector<2x8xf32> to vector<2x1xf32>
      %124 = vector.extract_strided_slice %19 {offsets = [5, 0], sizes = [1, 32], strides = [1, 1]} : vector<8x32xf32> to vector<1x32xf32>
      %125 = vector.broadcast %123 : vector<2x1xf32> to vector<2x32xf32>
      %126 = vector.broadcast %124 : vector<1x32xf32> to vector<2x32xf32>
      %127 = arith.mulf %125, %126 : vector<2x32xf32>
      %128 = vector.extract_strided_slice %96 {offsets = [0, 6], sizes = [2, 1], strides = [1, 1]} : vector<2x8xf32> to vector<2x1xf32>
      %129 = vector.extract_strided_slice %19 {offsets = [6, 0], sizes = [1, 32], strides = [1, 1]} : vector<8x32xf32> to vector<1x32xf32>
      %130 = vector.broadcast %128 : vector<2x1xf32> to vector<2x32xf32>
      %131 = vector.broadcast %129 : vector<1x32xf32> to vector<2x32xf32>
      %132 = arith.mulf %130, %131 : vector<2x32xf32>
      %133 = vector.extract_strided_slice %96 {offsets = [0, 7], sizes = [2, 1], strides = [1, 1]} : vector<2x8xf32> to vector<2x1xf32>
      %134 = vector.extract_strided_slice %19 {offsets = [7, 0], sizes = [1, 32], strides = [1, 1]} : vector<8x32xf32> to vector<1x32xf32>
      %135 = vector.broadcast %133 : vector<2x1xf32> to vector<2x32xf32>
      %136 = vector.broadcast %134 : vector<1x32xf32> to vector<2x32xf32>
      %137 = arith.mulf %135, %136 : vector<2x32xf32>
      %138 = arith.addf %102, %107 : vector<2x32xf32>
      %139 = arith.addf %112, %117 : vector<2x32xf32>
      %140 = arith.addf %122, %127 : vector<2x32xf32>
      %141 = arith.addf %132, %137 : vector<2x32xf32>
      %142 = arith.addf %138, %139 : vector<2x32xf32>
      %143 = arith.addf %140, %141 : vector<2x32xf32>
      %144 = arith.addf %142, %143 : vector<2x32xf32>
      %145 = vector.extract_strided_slice %32 {offsets = [2, 0], sizes = [2, 32], strides = [1, 1]} : vector<10x32xf32> to vector<2x32xf32>
      %146 = arith.addf %145, %144 : vector<2x32xf32>
      %147 = arith.negf %146 : vector<2x32xf32>
      %148 = math.exp %147 : vector<2x32xf32>
      %cst_27 = arith.constant 1.000000e+00 : f32
      %149 = vector.broadcast %cst_27 : f32 to vector<2x32xf32>
      %150 = arith.addf %149, %148 : vector<2x32xf32>
      %151 = arith.divf %149, %150 : vector<2x32xf32>
      %152 = math.tanh %146 : vector<2x32xf32>
      %153 = vector.extract_strided_slice %151 {offsets = [0, 0], sizes = [2, 8], strides = [1, 1]} : vector<2x32xf32> to vector<2x8xf32>
      %154 = vector.extract_strided_slice %151 {offsets = [0, 8], sizes = [2, 8], strides = [1, 1]} : vector<2x32xf32> to vector<2x8xf32>
      %155 = vector.extract_strided_slice %152 {offsets = [0, 16], sizes = [2, 8], strides = [1, 1]} : vector<2x32xf32> to vector<2x8xf32>
      %156 = vector.extract_strided_slice %151 {offsets = [0, 24], sizes = [2, 8], strides = [1, 1]} : vector<2x32xf32> to vector<2x8xf32>
      %157 = arith.mulf %154, %94 : vector<2x8xf32>
      %158 = arith.mulf %153, %155 : vector<2x8xf32>
      %159 = arith.addf %157, %158 : vector<2x8xf32>
      %160 = math.tanh %159 : vector<2x8xf32>
      %161 = arith.mulf %156, %160 : vector<2x8xf32>
      %c2 = arith.constant 2 : index
      %c0_28 = arith.constant 0 : index
      %162 = vector.load %arg9[%c2, %c0_28] : memref<10x8xf32, #tpu.memory_space<vmem>>, vector<2x8xf32>
      tpu.vector_store %arg9[%c2, %c0_28], %161 {strides = array<i32>} : memref<10x8xf32, #tpu.memory_space<vmem>>, vector<2x8xf32>,
      %163 = vector.extract_strided_slice %161 {offsets = [0, 0], sizes = [2, 1], strides = [1, 1]} : vector<2x8xf32> to vector<2x1xf32>
      %164 = vector.extract_strided_slice %19 {offsets = [0, 0], sizes = [1, 32], strides = [1, 1]} : vector<8x32xf32> to vector<1x32xf32>
      %165 = vector.broadcast %163 : vector<2x1xf32> to vector<2x32xf32>
      %166 = vector.broadcast %164 : vector<1x32xf32> to vector<2x32xf32>
      %167 = arith.mulf %165, %166 : vector<2x32xf32>
      %168 = vector.extract_strided_slice %161 {offsets = [0, 1], sizes = [2, 1], strides = [1, 1]} : vector<2x8xf32> to vector<2x1xf32>
      %169 = vector.extract_strided_slice %19 {offsets = [1, 0], sizes = [1, 32], strides = [1, 1]} : vector<8x32xf32> to vector<1x32xf32>
      %170 = vector.broadcast %168 : vector<2x1xf32> to vector<2x32xf32>
      %171 = vector.broadcast %169 : vector<1x32xf32> to vector<2x32xf32>
      %172 = arith.mulf %170, %171 : vector<2x32xf32>
      %173 = vector.extract_strided_slice %161 {offsets = [0, 2], sizes = [2, 1], strides = [1, 1]} : vector<2x8xf32> to vector<2x1xf32>
      %174 = vector.extract_strided_slice %19 {offsets = [2, 0], sizes = [1, 32], strides = [1, 1]} : vector<8x32xf32> to vector<1x32xf32>
      %175 = vector.broadcast %173 : vector<2x1xf32> to vector<2x32xf32>
      %176 = vector.broadcast %174 : vector<1x32xf32> to vector<2x32xf32>
      %177 = arith.mulf %175, %176 : vector<2x32xf32>
      %178 = vector.extract_strided_slice %161 {offsets = [0, 3], sizes = [2, 1], strides = [1, 1]} : vector<2x8xf32> to vector<2x1xf32>
      %179 = vector.extract_strided_slice %19 {offsets = [3, 0], sizes = [1, 32], strides = [1, 1]} : vector<8x32xf32> to vector<1x32xf32>
      %180 = vector.broadcast %178 : vector<2x1xf32> to vector<2x32xf32>
      %181 = vector.broadcast %179 : vector<1x32xf32> to vector<2x32xf32>
      %182 = arith.mulf %180, %181 : vector<2x32xf32>
      %183 = vector.extract_strided_slice %161 {offsets = [0, 4], sizes = [2, 1], strides = [1, 1]} : vector<2x8xf32> to vector<2x1xf32>
      %184 = vector.extract_strided_slice %19 {offsets = [4, 0], sizes = [1, 32], strides = [1, 1]} : vector<8x32xf32> to vector<1x32xf32>
      %185 = vector.broadcast %183 : vector<2x1xf32> to vector<2x32xf32>
      %186 = vector.broadcast %184 : vector<1x32xf32> to vector<2x32xf32>
      %187 = arith.mulf %185, %186 : vector<2x32xf32>
      %188 = vector.extract_strided_slice %161 {offsets = [0, 5], sizes = [2, 1], strides = [1, 1]} : vector<2x8xf32> to vector<2x1xf32>
      %189 = vector.extract_strided_slice %19 {offsets = [5, 0], sizes = [1, 32], strides = [1, 1]} : vector<8x32xf32> to vector<1x32xf32>
      %190 = vector.broadcast %188 : vector<2x1xf32> to vector<2x32xf32>
      %191 = vector.broadcast %189 : vector<1x32xf32> to vector<2x32xf32>
      %192 = arith.mulf %190, %191 : vector<2x32xf32>
      %193 = vector.extract_strided_slice %161 {offsets = [0, 6], sizes = [2, 1], strides = [1, 1]} : vector<2x8xf32> to vector<2x1xf32>
      %194 = vector.extract_strided_slice %19 {offsets = [6, 0], sizes = [1, 32], strides = [1, 1]} : vector<8x32xf32> to vector<1x32xf32>
      %195 = vector.broadcast %193 : vector<2x1xf32> to vector<2x32xf32>
      %196 = vector.broadcast %194 : vector<1x32xf32> to vector<2x32xf32>
      %197 = arith.mulf %195, %196 : vector<2x32xf32>
      %198 = vector.extract_strided_slice %161 {offsets = [0, 7], sizes = [2, 1], strides = [1, 1]} : vector<2x8xf32> to vector<2x1xf32>
      %199 = vector.extract_strided_slice %19 {offsets = [7, 0], sizes = [1, 32], strides = [1, 1]} : vector<8x32xf32> to vector<1x32xf32>
      %200 = vector.broadcast %198 : vector<2x1xf32> to vector<2x32xf32>
      %201 = vector.broadcast %199 : vector<1x32xf32> to vector<2x32xf32>
      %202 = arith.mulf %200, %201 : vector<2x32xf32>
      %203 = arith.addf %167, %172 : vector<2x32xf32>
      %204 = arith.addf %177, %182 : vector<2x32xf32>
      %205 = arith.addf %187, %192 : vector<2x32xf32>
      %206 = arith.addf %197, %202 : vector<2x32xf32>
      %207 = arith.addf %203, %204 : vector<2x32xf32>
      %208 = arith.addf %205, %206 : vector<2x32xf32>
      %209 = arith.addf %207, %208 : vector<2x32xf32>
      %210 = vector.extract_strided_slice %32 {offsets = [4, 0], sizes = [2, 32], strides = [1, 1]} : vector<10x32xf32> to vector<2x32xf32>
      %211 = arith.addf %210, %209 : vector<2x32xf32>
      %212 = arith.negf %211 : vector<2x32xf32>
      %213 = math.exp %212 : vector<2x32xf32>
      %cst_29 = arith.constant 1.000000e+00 : f32
      %214 = vector.broadcast %cst_29 : f32 to vector<2x32xf32>
      %215 = arith.addf %214, %213 : vector<2x32xf32>
      %216 = arith.divf %214, %215 : vector<2x32xf32>
      %217 = math.tanh %211 : vector<2x32xf32>
      %218 = vector.extract_strided_slice %216 {offsets = [0, 0], sizes = [2, 8], strides = [1, 1]} : vector<2x32xf32> to vector<2x8xf32>
      %219 = vector.extract_strided_slice %216 {offsets = [0, 8], sizes = [2, 8], strides = [1, 1]} : vector<2x32xf32> to vector<2x8xf32>
      %220 = vector.extract_strided_slice %217 {offsets = [0, 16], sizes = [2, 8], strides = [1, 1]} : vector<2x32xf32> to vector<2x8xf32>
      %221 = vector.extract_strided_slice %216 {offsets = [0, 24], sizes = [2, 8], strides = [1, 1]} : vector<2x32xf32> to vector<2x8xf32>
      %222 = arith.mulf %219, %159 : vector<2x8xf32>
      %223 = arith.mulf %218, %220 : vector<2x8xf32>
      %224 = arith.addf %222, %223 : vector<2x8xf32>
      %225 = math.tanh %224 : vector<2x8xf32>
      %226 = arith.mulf %221, %225 : vector<2x8xf32>
      %c4 = arith.constant 4 : index
      %c0_30 = arith.constant 0 : index
      %227 = vector.load %arg9[%c4, %c0_30] : memref<10x8xf32, #tpu.memory_space<vmem>>, vector<2x8xf32>
      tpu.vector_store %arg9[%c4, %c0_30], %226 {strides = array<i32>} : memref<10x8xf32, #tpu.memory_space<vmem>>, vector<2x8xf32>,
      %228 = vector.extract_strided_slice %226 {offsets = [0, 0], sizes = [2, 1], strides = [1, 1]} : vector<2x8xf32> to vector<2x1xf32>
      %229 = vector.extract_strided_slice %19 {offsets = [0, 0], sizes = [1, 32], strides = [1, 1]} : vector<8x32xf32> to vector<1x32xf32>
      %230 = vector.broadcast %228 : vector<2x1xf32> to vector<2x32xf32>
      %231 = vector.broadcast %229 : vector<1x32xf32> to vector<2x32xf32>
      %232 = arith.mulf %230, %231 : vector<2x32xf32>
      %233 = vector.extract_strided_slice %226 {offsets = [0, 1], sizes = [2, 1], strides = [1, 1]} : vector<2x8xf32> to vector<2x1xf32>
      %234 = vector.extract_strided_slice %19 {offsets = [1, 0], sizes = [1, 32], strides = [1, 1]} : vector<8x32xf32> to vector<1x32xf32>
      %235 = vector.broadcast %233 : vector<2x1xf32> to vector<2x32xf32>
      %236 = vector.broadcast %234 : vector<1x32xf32> to vector<2x32xf32>
      %237 = arith.mulf %235, %236 : vector<2x32xf32>
      %238 = vector.extract_strided_slice %226 {offsets = [0, 2], sizes = [2, 1], strides = [1, 1]} : vector<2x8xf32> to vector<2x1xf32>
      %239 = vector.extract_strided_slice %19 {offsets = [2, 0], sizes = [1, 32], strides = [1, 1]} : vector<8x32xf32> to vector<1x32xf32>
      %240 = vector.broadcast %238 : vector<2x1xf32> to vector<2x32xf32>
      %241 = vector.broadcast %239 : vector<1x32xf32> to vector<2x32xf32>
      %242 = arith.mulf %240, %241 : vector<2x32xf32>
      %243 = vector.extract_strided_slice %226 {offsets = [0, 3], sizes = [2, 1], strides = [1, 1]} : vector<2x8xf32> to vector<2x1xf32>
      %244 = vector.extract_strided_slice %19 {offsets = [3, 0], sizes = [1, 32], strides = [1, 1]} : vector<8x32xf32> to vector<1x32xf32>
      %245 = vector.broadcast %243 : vector<2x1xf32> to vector<2x32xf32>
      %246 = vector.broadcast %244 : vector<1x32xf32> to vector<2x32xf32>
      %247 = arith.mulf %245, %246 : vector<2x32xf32>
      %248 = vector.extract_strided_slice %226 {offsets = [0, 4], sizes = [2, 1], strides = [1, 1]} : vector<2x8xf32> to vector<2x1xf32>
      %249 = vector.extract_strided_slice %19 {offsets = [4, 0], sizes = [1, 32], strides = [1, 1]} : vector<8x32xf32> to vector<1x32xf32>
      %250 = vector.broadcast %248 : vector<2x1xf32> to vector<2x32xf32>
      %251 = vector.broadcast %249 : vector<1x32xf32> to vector<2x32xf32>
      %252 = arith.mulf %250, %251 : vector<2x32xf32>
      %253 = vector.extract_strided_slice %226 {offsets = [0, 5], sizes = [2, 1], strides = [1, 1]} : vector<2x8xf32> to vector<2x1xf32>
      %254 = vector.extract_strided_slice %19 {offsets = [5, 0], sizes = [1, 32], strides = [1, 1]} : vector<8x32xf32> to vector<1x32xf32>
      %255 = vector.broadcast %253 : vector<2x1xf32> to vector<2x32xf32>
      %256 = vector.broadcast %254 : vector<1x32xf32> to vector<2x32xf32>
      %257 = arith.mulf %255, %256 : vector<2x32xf32>
      %258 = vector.extract_strided_slice %226 {offsets = [0, 6], sizes = [2, 1], strides = [1, 1]} : vector<2x8xf32> to vector<2x1xf32>
      %259 = vector.extract_strided_slice %19 {offsets = [6, 0], sizes = [1, 32], strides = [1, 1]} : vector<8x32xf32> to vector<1x32xf32>
      %260 = vector.broadcast %258 : vector<2x1xf32> to vector<2x32xf32>
      %261 = vector.broadcast %259 : vector<1x32xf32> to vector<2x32xf32>
      %262 = arith.mulf %260, %261 : vector<2x32xf32>
      %263 = vector.extract_strided_slice %226 {offsets = [0, 7], sizes = [2, 1], strides = [1, 1]} : vector<2x8xf32> to vector<2x1xf32>
      %264 = vector.extract_strided_slice %19 {offsets = [7, 0], sizes = [1, 32], strides = [1, 1]} : vector<8x32xf32> to vector<1x32xf32>
      %265 = vector.broadcast %263 : vector<2x1xf32> to vector<2x32xf32>
      %266 = vector.broadcast %264 : vector<1x32xf32> to vector<2x32xf32>
      %267 = arith.mulf %265, %266 : vector<2x32xf32>
      %268 = arith.addf %232, %237 : vector<2x32xf32>
      %269 = arith.addf %242, %247 : vector<2x32xf32>
      %270 = arith.addf %252, %257 : vector<2x32xf32>
      %271 = arith.addf %262, %267 : vector<2x32xf32>
      %272 = arith.addf %268, %269 : vector<2x32xf32>
      %273 = arith.addf %270, %271 : vector<2x32xf32>
      %274 = arith.addf %272, %273 : vector<2x32xf32>
      %275 = vector.extract_strided_slice %32 {offsets = [6, 0], sizes = [2, 32], strides = [1, 1]} : vector<10x32xf32> to vector<2x32xf32>
      %276 = arith.addf %275, %274 : vector<2x32xf32>
      %277 = arith.negf %276 : vector<2x32xf32>
      %278 = math.exp %277 : vector<2x32xf32>
      %cst_31 = arith.constant 1.000000e+00 : f32
      %279 = vector.broadcast %cst_31 : f32 to vector<2x32xf32>
      %280 = arith.addf %279, %278 : vector<2x32xf32>
      %281 = arith.divf %279, %280 : vector<2x32xf32>
      %282 = math.tanh %276 : vector<2x32xf32>
      %283 = vector.extract_strided_slice %281 {offsets = [0, 0], sizes = [2, 8], strides = [1, 1]} : vector<2x32xf32> to vector<2x8xf32>
      %284 = vector.extract_strided_slice %281 {offsets = [0, 8], sizes = [2, 8], strides = [1, 1]} : vector<2x32xf32> to vector<2x8xf32>
      %285 = vector.extract_strided_slice %282 {offsets = [0, 16], sizes = [2, 8], strides = [1, 1]} : vector<2x32xf32> to vector<2x8xf32>
      %286 = vector.extract_strided_slice %281 {offsets = [0, 24], sizes = [2, 8], strides = [1, 1]} : vector<2x32xf32> to vector<2x8xf32>
      %287 = arith.mulf %284, %224 : vector<2x8xf32>
      %288 = arith.mulf %283, %285 : vector<2x8xf32>
      %289 = arith.addf %287, %288 : vector<2x8xf32>
      %290 = math.tanh %289 : vector<2x8xf32>
      %291 = arith.mulf %286, %290 : vector<2x8xf32>
      %c6 = arith.constant 6 : index
      %c0_32 = arith.constant 0 : index
      %292 = vector.load %arg9[%c6, %c0_32] : memref<10x8xf32, #tpu.memory_space<vmem>>, vector<2x8xf32>
      tpu.vector_store %arg9[%c6, %c0_32], %291 {strides = array<i32>} : memref<10x8xf32, #tpu.memory_space<vmem>>, vector<2x8xf32>,
      %293 = vector.extract_strided_slice %291 {offsets = [0, 0], sizes = [2, 1], strides = [1, 1]} : vector<2x8xf32> to vector<2x1xf32>
      %294 = vector.extract_strided_slice %19 {offsets = [0, 0], sizes = [1, 32], strides = [1, 1]} : vector<8x32xf32> to vector<1x32xf32>
      %295 = vector.broadcast %293 : vector<2x1xf32> to vector<2x32xf32>
      %296 = vector.broadcast %294 : vector<1x32xf32> to vector<2x32xf32>
      %297 = arith.mulf %295, %296 : vector<2x32xf32>
      %298 = vector.extract_strided_slice %291 {offsets = [0, 1], sizes = [2, 1], strides = [1, 1]} : vector<2x8xf32> to vector<2x1xf32>
      %299 = vector.extract_strided_slice %19 {offsets = [1, 0], sizes = [1, 32], strides = [1, 1]} : vector<8x32xf32> to vector<1x32xf32>
      %300 = vector.broadcast %298 : vector<2x1xf32> to vector<2x32xf32>
      %301 = vector.broadcast %299 : vector<1x32xf32> to vector<2x32xf32>
      %302 = arith.mulf %300, %301 : vector<2x32xf32>
      %303 = vector.extract_strided_slice %291 {offsets = [0, 2], sizes = [2, 1], strides = [1, 1]} : vector<2x8xf32> to vector<2x1xf32>
      %304 = vector.extract_strided_slice %19 {offsets = [2, 0], sizes = [1, 32], strides = [1, 1]} : vector<8x32xf32> to vector<1x32xf32>
      %305 = vector.broadcast %303 : vector<2x1xf32> to vector<2x32xf32>
      %306 = vector.broadcast %304 : vector<1x32xf32> to vector<2x32xf32>
      %307 = arith.mulf %305, %306 : vector<2x32xf32>
      %308 = vector.extract_strided_slice %291 {offsets = [0, 3], sizes = [2, 1], strides = [1, 1]} : vector<2x8xf32> to vector<2x1xf32>
      %309 = vector.extract_strided_slice %19 {offsets = [3, 0], sizes = [1, 32], strides = [1, 1]} : vector<8x32xf32> to vector<1x32xf32>
      %310 = vector.broadcast %308 : vector<2x1xf32> to vector<2x32xf32>
      %311 = vector.broadcast %309 : vector<1x32xf32> to vector<2x32xf32>
      %312 = arith.mulf %310, %311 : vector<2x32xf32>
      %313 = vector.extract_strided_slice %291 {offsets = [0, 4], sizes = [2, 1], strides = [1, 1]} : vector<2x8xf32> to vector<2x1xf32>
      %314 = vector.extract_strided_slice %19 {offsets = [4, 0], sizes = [1, 32], strides = [1, 1]} : vector<8x32xf32> to vector<1x32xf32>
      %315 = vector.broadcast %313 : vector<2x1xf32> to vector<2x32xf32>
      %316 = vector.broadcast %314 : vector<1x32xf32> to vector<2x32xf32>
      %317 = arith.mulf %315, %316 : vector<2x32xf32>
      %318 = vector.extract_strided_slice %291 {offsets = [0, 5], sizes = [2, 1], strides = [1, 1]} : vector<2x8xf32> to vector<2x1xf32>
      %319 = vector.extract_strided_slice %19 {offsets = [5, 0], sizes = [1, 32], strides = [1, 1]} : vector<8x32xf32> to vector<1x32xf32>
      %320 = vector.broadcast %318 : vector<2x1xf32> to vector<2x32xf32>
      %321 = vector.broadcast %319 : vector<1x32xf32> to vector<2x32xf32>
      %322 = arith.mulf %320, %321 : vector<2x32xf32>
      %323 = vector.extract_strided_slice %291 {offsets = [0, 6], sizes = [2, 1], strides = [1, 1]} : vector<2x8xf32> to vector<2x1xf32>
      %324 = vector.extract_strided_slice %19 {offsets = [6, 0], sizes = [1, 32], strides = [1, 1]} : vector<8x32xf32> to vector<1x32xf32>
      %325 = vector.broadcast %323 : vector<2x1xf32> to vector<2x32xf32>
      %326 = vector.broadcast %324 : vector<1x32xf32> to vector<2x32xf32>
      %327 = arith.mulf %325, %326 : vector<2x32xf32>
      %328 = vector.extract_strided_slice %291 {offsets = [0, 7], sizes = [2, 1], strides = [1, 1]} : vector<2x8xf32> to vector<2x1xf32>
      %329 = vector.extract_strided_slice %19 {offsets = [7, 0], sizes = [1, 32], strides = [1, 1]} : vector<8x32xf32> to vector<1x32xf32>
      %330 = vector.broadcast %328 : vector<2x1xf32> to vector<2x32xf32>
      %331 = vector.broadcast %329 : vector<1x32xf32> to vector<2x32xf32>
      %332 = arith.mulf %330, %331 : vector<2x32xf32>
      %333 = arith.addf %297, %302 : vector<2x32xf32>
      %334 = arith.addf %307, %312 : vector<2x32xf32>
      %335 = arith.addf %317, %322 : vector<2x32xf32>
      %336 = arith.addf %327, %332 : vector<2x32xf32>
      %337 = arith.addf %333, %334 : vector<2x32xf32>
      %338 = arith.addf %335, %336 : vector<2x32xf32>
      %339 = arith.addf %337, %338 : vector<2x32xf32>
      %340 = vector.extract_strided_slice %32 {offsets = [8, 0], sizes = [2, 32], strides = [1, 1]} : vector<10x32xf32> to vector<2x32xf32>
      %341 = arith.addf %340, %339 : vector<2x32xf32>
      %342 = arith.negf %341 : vector<2x32xf32>
      %343 = math.exp %342 : vector<2x32xf32>
      %cst_33 = arith.constant 1.000000e+00 : f32
      %344 = vector.broadcast %cst_33 : f32 to vector<2x32xf32>
      %345 = arith.addf %344, %343 : vector<2x32xf32>
      %346 = arith.divf %344, %345 : vector<2x32xf32>
      %347 = math.tanh %341 : vector<2x32xf32>
      %348 = vector.extract_strided_slice %346 {offsets = [0, 0], sizes = [2, 8], strides = [1, 1]} : vector<2x32xf32> to vector<2x8xf32>
      %349 = vector.extract_strided_slice %346 {offsets = [0, 8], sizes = [2, 8], strides = [1, 1]} : vector<2x32xf32> to vector<2x8xf32>
      %350 = vector.extract_strided_slice %347 {offsets = [0, 16], sizes = [2, 8], strides = [1, 1]} : vector<2x32xf32> to vector<2x8xf32>
      %351 = vector.extract_strided_slice %346 {offsets = [0, 24], sizes = [2, 8], strides = [1, 1]} : vector<2x32xf32> to vector<2x8xf32>
      %352 = arith.mulf %349, %289 : vector<2x8xf32>
      %353 = arith.mulf %348, %350 : vector<2x8xf32>
      %354 = arith.addf %352, %353 : vector<2x8xf32>
      %355 = math.tanh %354 : vector<2x8xf32>
      %356 = arith.mulf %351, %355 : vector<2x8xf32>
      %c8 = arith.constant 8 : index
      %c0_34 = arith.constant 0 : index
      %357 = vector.load %arg9[%c8, %c0_34] : memref<10x8xf32, #tpu.memory_space<vmem>>, vector<2x8xf32>
      tpu.vector_store %arg9[%c8, %c0_34], %356 {strides = array<i32>} : memref<10x8xf32, #tpu.memory_space<vmem>>, vector<2x8xf32>,
      scf.yield %356 : vector<2x8xf32>
    }
    %c8_i32_3 = arith.constant 8 : i32
    %c0_4 = arith.constant 0 : index
    %c0_5 = arith.constant 0 : index
    %5 = vector.load %arg6[%c0_4, %c0_5] : memref<1x8xf32, #tpu.memory_space<vmem>>, vector<1x8xf32>
    %6 = vector.broadcast %5 : vector<1x8xf32> to vector<2x8xf32>
    %7 = arith.mulf %4, %6 : vector<2x8xf32>
    %cst_6 = arith.constant dense<0.000000e+00> : vector<2xf32>
    %8 = vector.multi_reduction <add>, %7, %cst_6 [1] : vector<2x8xf32> to vector<2xf32>
    %9 = vector.shape_cast %8 : vector<2xf32> to vector<2x1xf32>
    %c0_7 = arith.constant 0 : index
    %c0_8 = arith.constant 0 : index
    %10 = vector.load %arg7[%c0_7, %c0_8] : memref<1x1xf32, #tpu.memory_space<vmem>>, vector<1x1xf32>
    %11 = vector.broadcast %10 : vector<1x1xf32> to vector<2x1xf32>
    %12 = arith.addf %9, %11 : vector<2x1xf32>
    %c0_9 = arith.constant 0 : index
    %c0_10 = arith.constant 0 : index
    %13 = vector.load %arg8[%c0_9, %c0_10] : memref<2x1xf32, #tpu.memory_space<vmem>>, vector<2x1xf32>
    tpu.vector_store %arg8[%c0_9, %c0_10], %12 {strides = array<i32>} : memref<2x1xf32, #tpu.memory_space<vmem>>, vector<2x1xf32>,
    return
  }
}

</mosaic_0001>

<bundles_post_ra>
// kernel: tpu_custom_call.1
= control target key start
LH: loop header
LB: loop body
LE: loop exit
PB: predicated region body
PF: predicated region fallthrough
CT: control target
= control target key end

     0   :  { %s1170_s0 = inlined_call_operand.vmem [shape: f32[10,8], index: 0, kind: input, shape index: {}]   ;;  %s1171_s1 = inlined_call_operand.vmem [shape: f32[8,2,8], index: 1, kind: input, shape index: {}]   ;;  %s1172_s2 = inlined_call_operand.vmem [shape: f32[8,2,8], index: 2, kind: input, shape index: {}]   ;;  %s1173_s3 = inlined_call_operand.hbm [shape: f32[8,8,32], index: 3, kind: input, shape index: {}]   ;;  %s1174_s4 = inlined_call_operand.hbm [shape: f32[8,8,32], index: 4, kind: input, shape index: {}]   ;;  %s1175_s5 = inlined_call_operand.vmem [shape: f32[8,1,32], index: 5, kind: input, shape index: {}]   ;;  %s1176_s6 = inlined_call_operand.vmem [shape: f32[1,8], index: 6, kind: input, shape index: {}]   ;;  %s1177_s7 = inlined_call_operand.<no memory space> [shape: f32[1,1], index: 7, kind: input, shape index: {}]   ;;  %s1178_s8 = inlined_call_operand.vmem [shape: f32[2,1], index: 8, kind: output, shape index: {}]  }
   0x1   :  { %v13_v0 = vstv %s1177_s7 }
   0x2   :  { %14 = vst [vmem:[#allocation3] sm:$0x1] %v13_v0 }
   0x3   :  { %15 = vsyncpa [#allocation5], 0 }
   0x4   :  { %16 = vsyncpa [#allocation7], 0  ;;  %s863_s29 = smov [#allocation4]   ;;  %s807_s11 = scalar_lea.hbm %s1173_s3, 1024 }
   0x5   :  { %s28_s30 = sshll.u32 %s863_s29, 4  ;;  %p808_p0 = scmp.ne.s32.totalorder %s1173_s3, %s807_s11  ;;  %s29_s30 = int_to_ptr.vmem [resolvable:$true] %s28_s30 }
   0x6   :  { %p811_p1 = scmp.lt.u32.totalorder %s807_s11, %s1173_s3 }
   0x8   :  { %p813_p2 = pnand %p811_p1, %p808_p0 }
   0xa   :  { %816 = shalt.err (!%p813_p2)
}
   0xb   :  { %s817_s7 = scalar_lea.vmem %s29_s30, 1024  ;;  %p822_p4 = scmp.lt.s32.totalorder %s29_s30, %s29_s30 }
   0xc   :  { %p818_p3 = scmp.ne.s32.totalorder %s29_s30, %s817_s7  ;;  %p823_p5 = scmp.lt.s32.totalorder %s817_s7, %s817_s7 }
   0xe   :  { %p824_p6 = por %p823_p5, %p822_p4 }
  0x10   :  { %p825_p7 = pnand %p824_p6, %p818_p3 }
  0x12   :  { %828 = shalt.err (!%p825_p7)
}
  0x13   :  { %s864_s16 = smov 128   ;;  %s865_s17 = smov 8  }
  0x14   :  { %34 = dma.hbm_to_vmem [thread:$0]  %s1173_s3, 1024, %s29_s30, [#allocation5], %s864_s16, %s864_s16, %s865_s17  }
  0x15   :  { %s866_s20 = smov [#allocation6]   ;;  %s829_s24 = scalar_lea.hbm %s1174_s4, 1024 }
  0x16   :  { %s40_s21 = sshll.u32 %s866_s20, 4  ;;  %p830_p8 = scmp.ne.s32.totalorder %s1174_s4, %s829_s24  ;;  %s41_s21 = int_to_ptr.vmem [resolvable:$true] %s40_s21 }
  0x17   :  { %p833_p9 = scmp.lt.u32.totalorder %s829_s24, %s1174_s4 }
  0x19   :  { %p835_p10 = pnand %p833_p9, %p830_p8 }
  0x1b   :  { %838 = shalt.err (!%p835_p10)
}
  0x1c   :  { %s839_s29 = scalar_lea.vmem %s41_s21, 1024  ;;  %p844_p12 = scmp.lt.s32.totalorder %s41_s21, %s41_s21 }
  0x1d   :  { %p840_p11 = scmp.ne.s32.totalorder %s41_s21, %s839_s29  ;;  %p845_p13 = scmp.lt.s32.totalorder %s839_s29, %s839_s29 }
  0x1f   :  { %p846_p0 = por %p845_p13, %p844_p12 }
  0x21   :  { %p847_p1 = pnand %p846_p0, %p840_p11 }
  0x23   :  { %850 = shalt.err (!%p847_p1)
}
  0x24   :  { %46 = dma.hbm_to_vmem [thread:$0]  %s1174_s4, 1024, %s41_s21, [#allocation7], %s864_s16, %s864_s16, %s865_s17  }
  0x25   :  { %855 = dma.done.wait [#allocation5], 1024  }
  0x26   :  { %856 = vsyncadd [#allocation5], 4294966272 }
  0x27   :  { %857 = dma.done.wait [#allocation7], 1024  }
  0x28   :  { %858 = vsyncadd [#allocation7], 4294966272  ;;  %vm61_vm0 = vcmask 64512   ;;  %vm63_vm1 = vcmask 58368   ;;  %v59_v1 = vld [vmem:[%s1170_s0] sm:$0xff]  ;;  %s969_s13 = smov 0  }
  0x29   :  { %v60_v2 = vld [vmem:[%s1170_s0 + $0x8] sm:$0x3]  ;;  %62 = vst.msk [vmem:[#allocation2] sm:$0xff] %vm61_vm0, %v59_v1 }
  0x2a   :  { %64 = vst.msk [vmem:[#allocation2 + $0x8] sm:$0x3] %vm63_vm1, %v60_v2 }
  0x2b LB: > { %v867_v4 = vmov 2   ;;  %s672_s0 = sshll.u32 %s861_s13, 3  ;;  %s673_s4 = sshll.u32 %s861_s13, 1  ;;  %v868_v5 = vmov 0   ;;  %v869_v9 = vmov 3   ;;  %v870_v10 = vmov 1   ;;  %s861_s13 = sphi %s969_s13, %s70_s13  }
  0x2c   : > { %728 = vset.pattern.permute.xlu1 %v867_v4  ;;  %726 = vset.pattern.permute.xlu0 %v868_v5  ;;  %s73_s14 = scalar_lea.vmem [#allocation4], %s672_s0  ;;  %s80_s16 = scalar_lea.vmem %s1171_s1, %s673_s4  ;;  %v871_v11 = vmov 4   ;;  %v872_v12 = vmov 5   ;;  %v873_v13 = vmov 6   ;;  %v874_v14 = vmov 7  }
  0x2d   : > { %v74_v6 = vld [vmem:[%s73_s14] sm:$0xff]  ;;  %s82_s19 = scalar_lea.vmem %s1172_s2, %s673_s4  ;;  %s875_s20 = smov 8   ;;  %v178_v18 = vlaneseq  ;;  %vm453_vm2 = vcmask 62468   ;;  %vm369_vm3 = vcmask 60418   ;;  %vm537_vm4 = vcmask 64518  }
  0x2e   : > { %v81_v8 = vld [vmem:[%s80_s16] sm:$0x3]  ;;  %687 = vmatprep.subr.mxu0 %v74_v6  ;;  %s75_s21 = scalar_lea.vmem [#allocation6], %s672_s0  ;;  %s77_s24 = scalar_lea.vmem %s1175_s5, %s861_s13 }
  0x2f   : > { %688 = vmatpush3.msra.mxu0 %v74_v6  ;;  %193 = vperm.xlu1 %728, %v81_v8   ;;  %v83_v15 = vld [vmem:[%s82_s19] sm:$0x3]  ;;  %v179_v21 = vshrl.u32 %v178_v18, 7  ;;  %s876_s25 = smov 112   ;;  %s879_s26 = smov 16   ;;  %v882_v18 = vmov 28  }
  0x30   : > { %v84_v3 = vld [vmem:[#allocation2] sm:$0xff]  ;;  %175 = vperm.xlu0 %726, %v81_v8   ;;  %s886_s27 = smov 104   ;;  %s70_s13 = sadd.s32 1, %s861_s13  }
  0x31   : > { %689 = vmatprep.mubr.msk.f32.mxu0 %vm61_vm0, %v84_v3  ;;  %v85_v7 = vld [vmem:[#allocation2 + $0x8] sm:$0x3]  ;;  %v198_v22 = vsub.s32 2, %v179_v21  ;;  %v207_v23 = vsub.s32 3, %v179_v21  ;;  %v180_v24 = vsub.s32 0, %v179_v21  ;;  %v189_v26 = vsub.s32 1, %v179_v21 }
  0x32   : > { %690 = vmatmul.mubr.msk.f32.vlgmr.msra.gmra.mrb[0].mxu0 %vm61_vm0, %v85_v7  ;;  %v76_v28 = vld [vmem:[%s75_s21] sm:$0xff]  ;;  %v216_v29 = vsub.s32 4, %v179_v21  ;;  %v234_v30 = vsub.s32 6, %v179_v21  ;;  %v243_v31 = vsub.s32 7, %v179_v21  ;;  %v225_v32 = vsub.s32 5, %v179_v21  ;;  %p67_p2 = scmp.ge.s32.totalorder %s70_s13, 8  }
  0x33   : > { %729 = vset.pattern.permute.xlu1 %v869_v9  ;;  %v989_v33 = vrot.slane %v76_v28, %v198_v22  ;;  %v991_v34 = vrot.slane %v76_v28, %v207_v23  ;;  %v993_v35 = vrot.slane %v76_v28, %v180_v24  ;;  %v995_v36 = vrot.slane %v76_v28, %v189_v26  ;;  %v674_v57 = vld [vmem:[%s77_s24] ss:$0 sm:$0xff]  ;;  %s887_s3 = smov (%p67_p2), 24   ;;  %s888_s30 = smov (%p67_p2), 104  }
  0x34   : > { %202 = vperm.xlu1 %729, %v81_v8   ;;  %727 = vset.pattern.permute.xlu0 %v870_v10  ;;  %v997_v37 = vrot.slane %v76_v28, %v216_v29  ;;  %v999_v38 = vrot.slane %v76_v28, %v234_v30  ;;  %v1001_v39 = vrot.slane %v76_v28, %v243_v31  ;;  %v885_v21 = vmov 31  }
  0x35   : > { %184 = vperm.xlu0 %727, %v81_v8   ;;  %v1003_v40 = vrot.slane %v76_v28, %v225_v32  ;;  %vm647_vm5 = vcmask (%p67_p2), 1024  }
  0x38   : > { %730 = vset.pattern.permute.xlu1 %v871_v11  ;;  %v877_v11 = vmov 25  }
  0x39   : > { %211 = vperm.xlu1 %730, %v81_v8   ;;  %731 = vset.pattern.permute.xlu0 %v872_v12  ;;  %v878_v12 = vmov 24  }
  0x3a   : > { %220 = vperm.xlu0 %731, %v81_v8  }
  0x3d   : > { %732 = vset.pattern.permute.xlu1 %v873_v13 }
  0x3e   : > { %229 = vperm.xlu1 %732, %v81_v8   ;;  %734 = vset.pattern.permute.xlu0 %v878_v12 }
  0x42   : > { %733 = vset.pattern.permute.xlu1 %v874_v14 }
  0x43   : > { %238 = vperm.xlu1 %733, %v81_v8  }
  0x47   : > { %262 = vrot.lane.b32.xlu1 %v83_v15, %s875_s20 }
  0x48   : > { %735 = vset.pattern.permute.xlu1 %v877_v11 }
  0xae   : > { %v194_v16 = vpop.permute.xlu1 %193 }
  0xaf   : > { %v176_v20 = vpop.permute.xlu0 %175  ;;  %v200_v43 = vmul.f32 %v989_v33, %v194_v16  ;;  %v880_v16 = vmov 26  }
  0xb0   : > { %v182_v45 = vmul.f32 %v993_v35, %v176_v20  ;;  %v884_v20 = vmov 29  }
  0xb3   : > { %v203_v17 = vpop.permute.xlu1 %202 }
  0xb4   : > { %v185_v27 = vpop.permute.xlu0 %184  ;;  %v209_v44 = vmul.f32 %v991_v34, %v203_v17  ;;  %v881_v17 = vmov 27  }
  0xb5   : > { %v191_v46 = vmul.f32 %v995_v36, %v185_v27 }
  0xb6   : > { %v247_v51 = vadd.f32 %v209_v44, %v200_v43 }
  0xb7   : > { %v246_v52 = vadd.f32 %v191_v46, %v182_v45 }
  0xb8   : > { %v212_v19 = vpop.permute.xlu1 %211 }
  0xb9   : > { %v221_v42 = vpop.permute.xlu0 %220  ;;  %v218_v47 = vmul.f32 %v997_v37, %v212_v19  ;;  %v250_v55 = vadd.f32 %v247_v51, %v246_v52  ;;  %v883_v19 = vmov 30  }
  0xba   : > { %v227_v50 = vmul.f32 %v1003_v40, %v221_v42 }
  0xbc   : > { %v248_v54 = vadd.f32 %v227_v50, %v218_v47 }
  0xbd   : > { %v230_v25 = vpop.permute.xlu1 %229 }
  0xbe   : > { %v236_v48 = vmul.f32 %v999_v38, %v230_v25 }
  0xc2   : > { %v239_v41 = vpop.permute.xlu1 %238 }
  0xc3   : > { %v245_v49 = vmul.f32 %v1001_v39, %v239_v41 }
  0xc5   : > { %v249_v53 = vadd.f32 %v245_v49, %v236_v48 }
  0xc6   : > { %v263_v7 = vpop.permute.xlu1 %262 }
  0xc7   : > { %v251_v56 = vadd.f32 %v249_v53, %v248_v54 }
  0xc9   : > { %v252_v61 = vadd.f32 %v251_v56, %v250_v55 }
 0x105   : > { %v691_v58 = vpop.f32.mrb[0].mxu0 }
 0x106   : > { %v1017_v59 = vadd.f32 %v691_v58, %v674_v57  ;;  %v164_v60 = vpop.f32.mrb[1].mxu0 }
 0x107   : > { %v1019_v62 = vadd.f32 %v674_v57, %v164_v60 }
 0x109   : > { %v253_v63 = vadd.f32 %v252_v61, %v1019_v62 }
 0x10b   : > { %767 = vtanh.f32 %v253_v63  ;;  %v677_v1 = vmul.f32 -1.442695, %v253_v63 }
 0x10d   : > { %769 = vpow2.f32 %v677_v1 }
 0x115   : > { %v768_v0 = vpop.eup %767 }
 0x116   : > { %267 = vrot.lane.b32.xlu0 %v768_v0, %s876_s25 }
 0x117   : > { %v770_v2 = vpop.eup %769 }
 0x118   : > { %v257_v3 = vadd.f32 1.0, %v770_v2 }
 0x11a   : > { %771 = vrcp.f32 %v257_v3 }
 0x124   : > { %v772_v4 = vpop.eup %771 }
 0x125   : > { %v265_v8 = vmul.f32 %v772_v4, %v263_v7 }
 0x188   : > { %v268_v5 = vpop.permute.xlu0 %267 }
 0x189   : > { %v270_v6 = vmul.f32 %v772_v4, %v268_v5 }
 0x18b   : > { %272 = vrot.lane.b32.xlu0 %v270_v6, %s875_s20 }
 0x1fd   : > { %v273_v9 = vpop.permute.xlu0 %272 }
 0x1fe   : > { %v1024_v10 = vadd.f32 %v273_v9, %v265_v8 }
 0x200   : > { %773 = vtanh.f32 %v1024_v10  ;;  %v346_v0 = vrot.slane %v1024_v10, 6 }
 0x20a   : > { %v774_v13 = vpop.eup %773 }
 0x20b   : > { %278 = vrot.lane.b32.xlu1 %v774_v13, %s879_s26 }
 0x27d   : > { %v279_v14 = vpop.permute.xlu1 %278 }
 0x27e   : > { %v1030_v15 = vmul.f32 %v772_v4, %v279_v14 }
 0x280   : > { %293 = vperm.xlu1 %735, %v1030_v15   ;;  %288 = vperm.xlu0 %734, %v1030_v15  }
 0x284   : > { %736 = vset.pattern.permute.xlu1 %v880_v16  ;;  %737 = vset.pattern.permute.xlu0 %v881_v17 }
 0x285   : > { %298 = vperm.xlu1 %736, %v1030_v15   ;;  %303 = vperm.xlu0 %737, %v1030_v15  }
 0x289   : > { %738 = vset.pattern.permute.xlu1 %v882_v18  ;;  %740 = vset.pattern.permute.xlu0 %v883_v19 }
 0x28a   : > { %308 = vperm.xlu1 %738, %v1030_v15   ;;  %318 = vperm.xlu0 %740, %v1030_v15  }
 0x28e   : > { %739 = vset.pattern.permute.xlu1 %v884_v20  ;;  %742 = vset.pattern.permute.xlu0 %v878_v12 }
 0x28f   : > { %313 = vperm.xlu1 %739, %v1030_v15  }
 0x293   : > { %741 = vset.pattern.permute.xlu1 %v885_v21 }
 0x294   : > { %323 = vperm.xlu1 %741, %v1030_v15  }
 0x298   : > { %743 = vset.pattern.permute.xlu1 %v877_v11 }
 0x2ff   : > { %v294_v22 = vpop.permute.xlu1 %293  ;;  %v289_v24 = vpop.permute.xlu0 %288 }
 0x300   : > { %v296_v31 = vmul.f32 %v294_v22, %v995_v36  ;;  %v291_v32 = vmul.f32 %v289_v24, %v993_v35 }
 0x302   : > { %v327_v47 = vadd.f32 %v296_v31, %v291_v32 }
 0x304   : > { %v299_v23 = vpop.permute.xlu1 %298  ;;  %v304_v26 = vpop.permute.xlu0 %303 }
 0x305   : > { %v301_v28 = vmul.f32 %v299_v23, %v989_v33  ;;  %v306_v29 = vmul.f32 %v304_v26, %v991_v34 }
 0x307   : > { %v328_v43 = vadd.f32 %v306_v29, %v301_v28 }
 0x309   : > { %v309_v25 = vpop.permute.xlu1 %308  ;;  %v319_v30 = vpop.permute.xlu0 %318  ;;  %v331_v50 = vadd.f32 %v328_v43, %v327_v47 }
 0x30a   : > { %v311_v44 = vmul.f32 %v309_v25, %v997_v37  ;;  %v321_v45 = vmul.f32 %v319_v30, %v999_v38 }
 0x30e   : > { %v314_v27 = vpop.permute.xlu1 %313 }
 0x30f   : > { %v316_v41 = vmul.f32 %v314_v27, %v1003_v40 }
 0x311   : > { %v329_v48 = vadd.f32 %v316_v41, %v311_v44 }
 0x313   : > { %v324_v42 = vpop.permute.xlu1 %323 }
 0x314   : > { %v326_v46 = vmul.f32 %v324_v42, %v1001_v39 }
 0x316   : > { %v330_v49 = vadd.f32 %v326_v46, %v321_v45 }
 0x318   : > { %v332_v51 = vadd.f32 %v330_v49, %v329_v48 }
 0x31a   : > { %v333_v52 = vadd.f32 %v332_v51, %v331_v50 }
 0x31c   : > { %v335_v53 = vrot.slane %v333_v52, 6 }
 0x31e   : > { %v337_v54 = vadd.f32 %v335_v53, %v1019_v62 }
 0x320   : > { %775 = vtanh.f32 %v337_v54  ;;  %v678_v56 = vmul.f32 -1.442695, %v337_v54 }
 0x322   : > { %777 = vpow2.f32 %v678_v56 }
 0x32a   : > { %v776_v55 = vpop.eup %775 }
 0x32b   : > { %350 = vrot.lane.b32.xlu1 %v776_v55, %s876_s25 }
 0x32c   : > { %v778_v57 = vpop.eup %777 }
 0x32d   : > { %v341_v58 = vadd.f32 1.0, %v778_v57 }
 0x32f   : > { %779 = vrcp.f32 %v341_v58 }
 0x339   : > { %v780_v60 = vpop.eup %779 }
 0x33a   : > { %v348_v1 = vmul.f32 %v780_v60, %v346_v0 }
 0x39d   : > { %v351_v61 = vpop.permute.xlu1 %350 }
 0x39e   : > { %v353_v63 = vmul.f32 %v780_v60, %v351_v61 }
 0x3a0   : > { %355 = vrot.lane.b32.xlu0 %v353_v63, %s875_s20 }
 0x412   : > { %v356_v2 = vpop.permute.xlu0 %355 }
 0x413   : > { %v358_v3 = vadd.f32 %v356_v2, %v348_v1 }
 0x415   : > { %781 = vtanh.f32 %v358_v3  ;;  %v430_v56 = vrot.slane %v358_v3, 6 }
 0x41f   : > { %v782_v4 = vpop.eup %781 }
 0x420   : > { %361 = vrot.lane.b32.xlu1 %v782_v4, %s879_s26 }
 0x492   : > { %v362_v5 = vpop.permute.xlu1 %361 }
 0x493   : > { %v1061_v6 = vmul.f32 %v780_v60, %v362_v5 }
 0x495   : > { %377 = vperm.xlu1 %743, %v1061_v6   ;;  %372 = vperm.xlu0 %742, %v1061_v6  }
 0x499   : > { %744 = vset.pattern.permute.xlu1 %v880_v16  ;;  %745 = vset.pattern.permute.xlu0 %v881_v17 }
 0x49a   : > { %382 = vperm.xlu1 %744, %v1061_v6   ;;  %387 = vperm.xlu0 %745, %v1061_v6  }
 0x49e   : > { %746 = vset.pattern.permute.xlu1 %v882_v18  ;;  %748 = vset.pattern.permute.xlu0 %v883_v19 }
 0x49f   : > { %392 = vperm.xlu1 %746, %v1061_v6   ;;  %402 = vperm.xlu0 %748, %v1061_v6  }
 0x4a3   : > { %747 = vset.pattern.permute.xlu1 %v884_v20  ;;  %750 = vset.pattern.permute.xlu0 %v878_v12 }
 0x4a4   : > { %397 = vperm.xlu1 %747, %v1061_v6  }
 0x4a8   : > { %749 = vset.pattern.permute.xlu1 %v885_v21 }
 0x4a9   : > { %407 = vperm.xlu1 %749, %v1061_v6  }
 0x4ad   : > { %751 = vset.pattern.permute.xlu1 %v877_v11 }
 0x514   : > { %v378_v7 = vpop.permute.xlu1 %377  ;;  %v373_v9 = vpop.permute.xlu0 %372 }
 0x515   : > { %v380_v25 = vmul.f32 %v378_v7, %v995_v36  ;;  %v375_v26 = vmul.f32 %v373_v9, %v993_v35 }
 0x517   : > { %v411_v41 = vadd.f32 %v380_v25, %v375_v26 }
 0x519   : > { %v383_v8 = vpop.permute.xlu1 %382  ;;  %v388_v13 = vpop.permute.xlu0 %387 }
 0x51a   : > { %v385_v22 = vmul.f32 %v383_v8, %v989_v33  ;;  %v390_v23 = vmul.f32 %v388_v13, %v991_v34 }
 0x51c   : > { %v412_v29 = vadd.f32 %v390_v23, %v385_v22 }
 0x51e   : > { %v393_v10 = vpop.permute.xlu1 %392  ;;  %v403_v24 = vpop.permute.xlu0 %402  ;;  %v415_v44 = vadd.f32 %v412_v29, %v411_v41 }
 0x51f   : > { %v395_v30 = vmul.f32 %v393_v10, %v997_v37  ;;  %v405_v31 = vmul.f32 %v403_v24, %v999_v38 }
 0x523   : > { %v398_v14 = vpop.permute.xlu1 %397 }
 0x524   : > { %v400_v27 = vmul.f32 %v398_v14, %v1003_v40 }
 0x526   : > { %v413_v42 = vadd.f32 %v400_v27, %v395_v30 }
 0x528   : > { %v408_v28 = vpop.permute.xlu1 %407 }
 0x529   : > { %v410_v32 = vmul.f32 %v408_v28, %v1001_v39 }
 0x52b   : > { %v414_v43 = vadd.f32 %v410_v32, %v405_v31 }
 0x52d   : > { %v416_v45 = vadd.f32 %v414_v43, %v413_v42 }
 0x52f   : > { %v417_v46 = vadd.f32 %v416_v45, %v415_v44 }
 0x531   : > { %v419_v47 = vrot.slane %v417_v46, 6 }
 0x533   : > { %v421_v48 = vadd.f32 %v419_v47, %v1019_v62 }
 0x535   : > { %783 = vtanh.f32 %v421_v48  ;;  %v679_v50 = vmul.f32 -1.442695, %v421_v48 }
 0x537   : > { %785 = vpow2.f32 %v679_v50 }
 0x53f   : > { %v784_v49 = vpop.eup %783 }
 0x540   : > { %434 = vrot.lane.b32.xlu1 %v784_v49, %s876_s25 }
 0x541   : > { %v786_v51 = vpop.eup %785 }
 0x542   : > { %v425_v52 = vadd.f32 1.0, %v786_v51 }
 0x544   : > { %787 = vrcp.f32 %v425_v52 }
 0x54e   : > { %v788_v53 = vpop.eup %787 }
 0x54f   : > { %v432_v57 = vmul.f32 %v788_v53, %v430_v56 }
 0x5b2   : > { %v435_v54 = vpop.permute.xlu1 %434 }
 0x5b3   : > { %v437_v55 = vmul.f32 %v788_v53, %v435_v54 }
 0x5b5   : > { %439 = vrot.lane.b32.xlu0 %v437_v55, %s875_s20 }
 0x627   : > { %v440_v58 = vpop.permute.xlu0 %439 }
 0x628   : > { %v442_v60 = vadd.f32 %v440_v58, %v432_v57 }
 0x62a   : > { %789 = vtanh.f32 %v442_v60  ;;  %v514_v49 = vrot.slane %v442_v60, 6 }
 0x634   : > { %v790_v61 = vpop.eup %789 }
 0x635   : > { %445 = vrot.lane.b32.xlu1 %v790_v61, %s879_s26 }
 0x6a7   : > { %v446_v63 = vpop.permute.xlu1 %445 }
 0x6a8   : > { %v1091_v0 = vmul.f32 %v788_v53, %v446_v63 }
 0x6aa   : > { %461 = vperm.xlu1 %751, %v1091_v0   ;;  %456 = vperm.xlu0 %750, %v1091_v0  }
 0x6ae   : > { %752 = vset.pattern.permute.xlu1 %v880_v16  ;;  %753 = vset.pattern.permute.xlu0 %v881_v17 }
 0x6af   : > { %466 = vperm.xlu1 %752, %v1091_v0   ;;  %471 = vperm.xlu0 %753, %v1091_v0  }
 0x6b3   : > { %754 = vset.pattern.permute.xlu1 %v882_v18  ;;  %756 = vset.pattern.permute.xlu0 %v883_v19 }
 0x6b4   : > { %476 = vperm.xlu1 %754, %v1091_v0   ;;  %486 = vperm.xlu0 %756, %v1091_v0  }
 0x6b8   : > { %755 = vset.pattern.permute.xlu1 %v884_v20  ;;  %758 = vset.pattern.permute.xlu0 %v878_v12 }
 0x6b9   : > { %481 = vperm.xlu1 %755, %v1091_v0  }
 0x6bd   : > { %757 = vset.pattern.permute.xlu1 %v885_v21 }
 0x6be   : > { %491 = vperm.xlu1 %757, %v1091_v0  }
 0x6c2   : > { %759 = vset.pattern.permute.xlu1 %v877_v11 }
 0x729   : > { %v462_v1 = vpop.permute.xlu1 %461  ;;  %v457_v3 = vpop.permute.xlu0 %456 }
 0x72a   : > { %v464_v12 = vmul.f32 %v462_v1, %v995_v36  ;;  %v459_v13 = vmul.f32 %v457_v3, %v993_v35 }
 0x72c   : > { %v495_v26 = vadd.f32 %v464_v12, %v459_v13 }
 0x72e   : > { %v467_v2 = vpop.permute.xlu1 %466  ;;  %v472_v5 = vpop.permute.xlu0 %471 }
 0x72f   : > { %v469_v8 = vmul.f32 %v467_v2, %v989_v33  ;;  %v474_v9 = vmul.f32 %v472_v5, %v991_v34 }
 0x731   : > { %v496_v23 = vadd.f32 %v474_v9, %v469_v8 }
 0x733   : > { %v477_v4 = vpop.permute.xlu1 %476  ;;  %v487_v10 = vpop.permute.xlu0 %486  ;;  %v499_v29 = vadd.f32 %v496_v23, %v495_v26 }
 0x734   : > { %v479_v11 = vmul.f32 %v477_v4, %v997_v37  ;;  %v489_v24 = vmul.f32 %v487_v10, %v999_v38 }
 0x738   : > { %v482_v7 = vpop.permute.xlu1 %481 }
 0x739   : > { %v484_v14 = vmul.f32 %v482_v7, %v1003_v40 }
 0x73b   : > { %v497_v27 = vadd.f32 %v484_v14, %v479_v11 }
 0x73d   : > { %v492_v22 = vpop.permute.xlu1 %491 }
 0x73e   : > { %v494_v25 = vmul.f32 %v492_v22, %v1001_v39 }
 0x740   : > { %v498_v28 = vadd.f32 %v494_v25, %v489_v24 }
 0x742   : > { %v500_v30 = vadd.f32 %v498_v28, %v497_v27 }
 0x744   : > { %v501_v31 = vadd.f32 %v500_v30, %v499_v29 }
 0x746   : > { %v503_v32 = vrot.slane %v501_v31, 6 }
 0x748   : > { %v505_v41 = vadd.f32 %v503_v32, %v1019_v62 }
 0x74a   : > { %791 = vtanh.f32 %v505_v41  ;;  %v680_v43 = vmul.f32 -1.442695, %v505_v41  ;;  %v683_v41 = vld [vmem:[#allocation3] ss:$0 sm:$0xff] (%p67_p2) }
 0x74c   : > { %793 = vpow2.f32 %v680_v43 }
 0x754   : > { %v792_v42 = vpop.eup %791 }
 0x755   : > { %518 = vrot.lane.b32.xlu1 %v792_v42, %s876_s25 }
 0x756   : > { %v794_v44 = vpop.eup %793 }
 0x757   : > { %v509_v45 = vadd.f32 1.0, %v794_v44 }
 0x759   : > { %795 = vrcp.f32 %v509_v45 }
 0x763   : > { %v796_v46 = vpop.eup %795 }
 0x764   : > { %v516_v50 = vmul.f32 %v796_v46, %v514_v49 }
 0x7c7   : > { %v519_v47 = vpop.permute.xlu1 %518 }
 0x7c8   : > { %v521_v48 = vmul.f32 %v796_v46, %v519_v47 }
 0x7ca   : > { %523 = vrot.lane.b32.xlu0 %v521_v48, %s875_s20 }
 0x83c   : > { %v524_v51 = vpop.permute.xlu0 %523 }
 0x83d   : > { %v1120_v52 = vadd.f32 %v524_v51, %v516_v50 }
 0x83f   : > { %797 = vtanh.f32 %v1120_v52 }
 0x849   : > { %v798_v62 = vpop.eup %797 }
 0x84a   : > { %529 = vrot.lane.b32.xlu1 %v798_v62, %s879_s26 }
 0x8bc   : > { %v530_v53 = vpop.permute.xlu1 %529 }
 0x8bd   : > { %v1124_v54 = vmul.f32 %v796_v46, %v530_v53 }
 0x8bf   : > { %545 = vperm.xlu1 %759, %v1124_v54   ;;  %540 = vperm.xlu0 %758, %v1124_v54  }
 0x8c3   : > { %760 = vset.pattern.permute.xlu1 %v880_v16  ;;  %761 = vset.pattern.permute.xlu0 %v881_v17 }
 0x8c4   : > { %550 = vperm.xlu1 %760, %v1124_v54   ;;  %555 = vperm.xlu0 %761, %v1124_v54  }
 0x8c8   : > { %762 = vset.pattern.permute.xlu1 %v882_v18  ;;  %764 = vset.pattern.permute.xlu0 %v883_v19 }
 0x8c9   : > { %560 = vperm.xlu1 %762, %v1124_v54   ;;  %570 = vperm.xlu0 %764, %v1124_v54  }
 0x8cd   : > { %763 = vset.pattern.permute.xlu1 %v884_v20  ;;  %766 = vset.pattern.permute.xlu0 %v885_v21 }
 0x8ce   : > { %565 = vperm.xlu1 %763, %v1124_v54  }
 0x8d2   : > { %765 = vset.pattern.permute.xlu1 %v885_v21 }
 0x8d3   : > { %575 = vperm.xlu1 %765, %v1124_v54  }
 0x93e   : > { %v546_v16 = vpop.permute.xlu1 %545  ;;  %v541_v55 = vpop.permute.xlu0 %540 }
 0x93f   : > { %v548_v20 = vmul.f32 %v546_v16, %v995_v36  ;;  %v543_v61 = vmul.f32 %v541_v55, %v993_v35 }
 0x941   : > { %v579_v5 = vadd.f32 %v548_v20, %v543_v61 }
 0x943   : > { %v551_v17 = vpop.permute.xlu1 %550  ;;  %v556_v56 = vpop.permute.xlu0 %555 }
 0x944   : > { %v553_v57 = vmul.f32 %v551_v17, %v989_v33  ;;  %v558_v58 = vmul.f32 %v556_v56, %v991_v34 }
 0x946   : > { %v580_v1 = vadd.f32 %v558_v58, %v553_v57 }
 0x948   : > { %v561_v18 = vpop.permute.xlu1 %560  ;;  %v571_v60 = vpop.permute.xlu0 %570  ;;  %v583_v8 = vadd.f32 %v580_v1, %v579_v5 }
 0x949   : > { %v563_v2 = vmul.f32 %v561_v18, %v997_v37  ;;  %v573_v3 = vmul.f32 %v571_v60, %v999_v38 }
 0x94d   : > { %v566_v19 = vpop.permute.xlu1 %565 }
 0x94e   : > { %v568_v63 = vmul.f32 %v566_v19, %v1003_v40 }
 0x950   : > { %v581_v7 = vadd.f32 %v568_v63, %v563_v2 }
 0x952   : > { %v576_v21 = vpop.permute.xlu1 %575 }
 0x953   : > { %v578_v4 = vmul.f32 %v576_v21, %v1001_v39 }
 0x955   : > { %v582_v33 = vadd.f32 %v578_v4, %v573_v3 }
 0x957   : > { %v584_v34 = vadd.f32 %v582_v33, %v581_v7 }
 0x959   : > { %v585_v9 = vadd.f32 %v584_v34, %v583_v8 }
 0x95b   : > { %v587_v10 = vrot.slane %v585_v9, 6 }
 0x95d   : > { %v589_v36 = vadd.f32 %v587_v10, %v1017_v59  ;;  %v598_v59 = vrot.slane %v1120_v52, 6 }
 0x95f   : > { %799 = vtanh.f32 %v589_v36  ;;  %v681_v40 = vmul.f32 -1.442695, %v589_v36 }
 0x961   : > { %801 = vpow2.f32 %v681_v40 }
 0x969   : > { %v800_v35 = vpop.eup %799 }
 0x96a   : > { %602 = vrot.lane.b32.xlu1 %v800_v35, %s876_s25 }
 0x96b   : > { %v802_v37 = vpop.eup %801 }
 0x96c   : > { %v593_v12 = vadd.f32 1.0, %v802_v37 }
 0x96e   : > { %803 = vrcp.f32 %v593_v12 }
 0x978   : > { %v804_v38 = vpop.eup %803 }
 0x979   : > { %v600_v14 = vmul.f32 %v804_v38, %v598_v59 }
 0x9dc   : > { %v603_v39 = vpop.permute.xlu1 %602 }
 0x9dd   : > { %v605_v13 = vmul.f32 %v804_v38, %v603_v39 }
 0x9df   : > { %607 = vrot.lane.b32.xlu0 %v605_v13, %s875_s20 }
 0x9e3   : > { %283 = vrot.lane.b32.xlu0 %v1030_v15, %s886_s27 }
 0x9e7   : > { %450 = vrot.lane.b32.xlu0 %v1091_v0, %s886_s27 }
 0xa51   : > { %v608_v22 = vpop.permute.xlu0 %607 }
 0xa52   : > { %v610_v23 = vadd.f32 %v608_v22, %v600_v14 }
 0xa54   : > { %805 = vtanh.f32 %v610_v23 }
 0xa55   : > { %v284_v11 = vpop.permute.xlu0 %283 }
 0xa56   : > { %286 = vst.msk [vmem:[#allocation2] sm:$0x3] %vm63_vm1, %v284_v11 }
 0xa59   : > { %v451_v24 = vpop.permute.xlu0 %450 }
 0xa5a   : > { %454 = vst.msk [vmem:[#allocation2] sm:$0x30] %vm453_vm2, %v451_v24 }
 0xa5e   : > { %v806_v25 = vpop.eup %805 }
 0xa5f   : > { %613 = vrot.lane.b32.xlu1 %v806_v25, %s879_s26 }
 0xa63   : > { %366 = vrot.lane.b32.xlu1 %v1061_v6, %s886_s27  ;;  %v682_v6 = vld [vmem:[%s1176_s6] ss:$0 sm:$0xff] (%p67_p2) }
 0xa67   : > { %534 = vrot.lane.b32.xlu1 %v1124_v54, %s886_s27 }
 0xad1   : > { %v614_v15 = vpop.permute.xlu1 %613 }
 0xad2   : > { %v616_v0 = vmul.f32 %v804_v38, %v614_v15 }
 0xad4   : > { %618 = vrot.lane.b32.xlu0 %v616_v0, %s886_s27 }
 0xad5   : > { %v367_v26 = vpop.permute.xlu1 %366 }
 0xad6   : > { %370 = vst.msk [vmem:[#allocation2] sm:$0xc] %vm369_vm3, %v367_v26 }
 0xad8   :  { %628 = vrot.lane.b32.xlu0 (%p67_p2), %v682_v6, %s887_s3 }
 0xad9   : > { %v535_v27 = vpop.permute.xlu1 %534 }
 0xada   : > { %538 = vst.msk [vmem:[#allocation2] sm:$0xc0] %vm537_vm4, %v535_v27 }
 0xb41   :  { %69 = sbr.rel (!%p67_p2) target bundleno = 43 (0x2b), region = 72 }
 0xb46   : > { %v619_v28 = vpop.permute.xlu0 %618 }
 0xb47   : > { %621 = vst.msk [vmem:[#allocation2 + $0x8] sm:$0x3] %vm63_vm1, %v619_v28 }
 0xb4a   :  { %v629_v29 = vpop.permute.xlu0 %628 }
 0xb4b   :  { %v631_v30 = vmul.f32 %v629_v29, %v616_v0 }
 0xb4d   :  { %633 = vrot.lane.b32.xlu0 %v631_v30, %s888_s30 }
 0xbbf   :  { %v634_v31 = vpop.permute.xlu0 %633 }
 0xbc0   :  { %v636_v32 = vsel %vm63_vm1, %v634_v31, 0.0 }
 0xbc1   :  { %637 = vadd.xlane.f32.xlu1 %v636_v32 }
 0xc4e   :  { %v638_v42 = vpop.xlane.xlu1 %637 }
 0xc4f   :  { %v646_v43 = vadd.f32 %v683_v41, %v638_v42 }
 0xc51   :  { %648 = vst.msk [vmem:[%s1178_s8] sm:$0x3] %vm647_vm5, %v646_v43 }
 0xc52   :  { %653 = vsyncpa [#allocation5], 1 }
 0xc53   :  { %654 = vsyncpa [#allocation7], 1 }

</bundles_post_ra>
